<compile_context>
chip_gen: v5e
topology: v5e:2x2
jax: 0.10.0
libtpu: 0.0.40
codegen_flags: <defaults>
</compile_context>

<pallas_src>
import jax
import jax.numpy as jnp
from jax.experimental import pallas as pl
from jax.experimental.pallas import tpu as pltpu


def rnn_fused_kernel(ids_ref,    # SMEM (T, B) int32 token ids (scalar prefetch)
                     emb_ref,    # VMEM (V, H)      bf16 embedding table (resident)
                     h0_ref,     # VMEM (L, B, H)   f32 initial hidden state (resident)
                     wih_ref,    # VMEM (L, H, 3H)  bf16 input->gates weights, gate order r|z|n
                     whh_ref,    # VMEM (L, H, 3H)  bf16 hidden->gates weights, gate order r|z|n
                     bih_ref,    # VMEM (L, 1, 3H)  f32 input-gate bias
                     bhh_ref,    # VMEM (L, 1, 3H)  f32 hidden-gate bias
                     wdec_ref,   # VMEM (H, O)      bf16 decoder weight
                     bdec_ref,   # VMEM (1, O)      f32 decoder bias
                     h_ref,      # VMEM (L, B, H)   f32 carried hidden (output, resident over T)
                     y_ref):     # VMEM (1, B, O)   f32 logits for this timestep
    t = pl.program_id(0)
    L, B, H = h0_ref.shape
    V = emb_ref.shape[0]
    f32 = jnp.float32

    # Load the caller's hidden state once; afterwards h_ref is the live state across the grid.
    @pl.when(t == 0)
    def _():
        h_ref[...] = h0_ref[...]

    # ---- embedding gather as a one-hot matmul on the MXU (ids are SMEM scalars) ----
    iota_v = jax.lax.broadcasted_iota(jnp.int32, (1, V), 1)
    one_hot = jnp.concatenate(
        [(iota_v == ids_ref[t, b]).astype(f32) for b in range(B)], axis=0)       # (B, V)
    x = jnp.dot(one_hot, emb_ref[...].astype(f32), preferred_element_type=f32)   # (B, H)

    # ---- GRU layers (seq_len == 1 per forward() call), statically unrolled ----
    for l in range(L):
        h = h_ref[l]                                                              # (B, H)
        gi = jnp.dot(x, wih_ref[l].astype(f32), preferred_element_type=f32) + bih_ref[l]
        gh = jnp.dot(h, whh_ref[l].astype(f32), preferred_element_type=f32) + bhh_ref[l]
        r = jax.nn.sigmoid(gi[:, 0:H] + gh[:, 0:H])
        z = jax.nn.sigmoid(gi[:, H:2 * H] + gh[:, H:2 * H])
        n = jnp.tanh(gi[:, 2 * H:3 * H] + r * gh[:, 2 * H:3 * H])
        h_new = (1.0 - z) * n + z * h
        h_ref[l] = h_new
        x = h_new

    # ---- decoder (nn.Linear) on the top layer's output ----
    y_ref[0] = (jnp.dot(x, wdec_ref[...].astype(f32), preferred_element_type=f32)
                + bdec_ref[...])


def prepare_kernel_params(params):
    """One-time re-layout: streamed matrices -> bf16, biases kept f32 and reshaped for broadcast."""
    bf16, f32 = jnp.bfloat16, jnp.float32
    L, H, H3 = params["w_ih"].shape
    return {
        "emb":   params["embedding"].astype(bf16),                 # (V, H)
        "w_ih":  params["w_ih"].astype(bf16),                      # (L, H, 3H)
        "w_hh":  params["w_hh"].astype(bf16),                      # (L, H, 3H)
        "b_ih":  params["b_ih"].reshape(L, 1, H3).astype(f32),     # (L, 1, 3H)
        "b_hh":  params["b_hh"].reshape(L, 1, H3).astype(f32),     # (L, 1, 3H)
        "w_dec": params["w_dec"].astype(bf16),                     # (H, O)
        "b_dec": params["b_dec"].reshape(1, -1).astype(f32),       # (1, O)
    }


def rnn_model_forward_seq(x_ids_seq, hidden, kparams):
    """Run T sequential RNNModel.forward steps fused in one kernel launch.

    x_ids_seq: (T, B) int32; hidden: (L, B, H) f32.
    Returns (y_seq (T, B, O), hidden_T (L, B, H)).
    """
    T, B = x_ids_seq.shape
    L, _, H = hidden.shape
    O = kparams["w_dec"].shape[1]

    grid_spec = pltpu.PrefetchScalarGridSpec(
        num_scalar_prefetch=1,            # token ids -> SMEM; gather is fused in-kernel
        grid=(T,),                        # weights + hidden stay VMEM-resident across T steps
        in_specs=[
            pl.BlockSpec(kparams["emb"].shape,   lambda t, ids: (0, 0)),
            pl.BlockSpec((L, B, H),              lambda t, ids: (0, 0, 0)),
            pl.BlockSpec(kparams["w_ih"].shape,  lambda t, ids: (0, 0, 0)),
            pl.BlockSpec(kparams["w_hh"].shape,  lambda t, ids: (0, 0, 0)),
            pl.BlockSpec(kparams["b_ih"].shape,  lambda t, ids: (0, 0, 0)),
            pl.BlockSpec(kparams["b_hh"].shape,  lambda t, ids: (0, 0, 0)),
            pl.BlockSpec(kparams["w_dec"].shape, lambda t, ids: (0, 0)),
            pl.BlockSpec(kparams["b_dec"].shape, lambda t, ids: (0, 0)),
        ],
        out_specs=[
            pl.BlockSpec((L, B, H), lambda t, ids: (0, 0, 0)),   # carried hidden, one writeback
            pl.BlockSpec((1, B, O), lambda t, ids: (t, 0, 0)),   # per-step logits
        ],
    )

    h_out, y_seq = pl.pallas_call(
        rnn_fused_kernel,
        out_shape=(
            jax.ShapeDtypeStruct((L, B, H), jnp.float32),
            jax.ShapeDtypeStruct((T, B, O), jnp.float32),
        ),
        grid_spec=grid_spec,
        compiler_params=pltpu.CompilerParams(
            dimension_semantics=("arbitrary",),        # hidden state carries across timesteps
            vmem_limit_bytes=32 * 1024 * 1024,
        ),
    )(x_ids_seq, kparams["emb"], hidden, kparams["w_ih"], kparams["w_hh"],
      kparams["b_ih"], kparams["b_hh"], kparams["w_dec"], kparams["b_dec"])

    return y_seq, h_out


def rnn_model_forward(x_ids, hidden, kparams):
    """Mirrors RNNModel.forward(x, hidden) -> (y_pred, hidden); single step == T=1."""
    y_seq, h_out = rnn_model_forward_seq(x_ids[None, :], hidden, kparams)
    return y_seq[0], h_out


# ---------------------------- pure-JAX reference ----------------------------
def rnn_model_forward_ref(x_ids, hidden, params):
    """Reference matching torch.nn.Embedding / GRU / Linear semantics for one step."""
    H = params["embedding"].shape[1]
    hp = jax.lax.Precision.HIGHEST
    x = jnp.take(params["embedding"], x_ids, axis=0)
    new_h = []
    for l in range(params["w_ih"].shape[0]):
        h = hidden[l]
        gi = jnp.dot(x, params["w_ih"][l], precision=hp) + params["b_ih"][l]
        gh = jnp.dot(h, params["w_hh"][l], precision=hp) + params["b_hh"][l]
        r = jax.nn.sigmoid(gi[:, :H] + gh[:, :H])
        z = jax.nn.sigmoid(gi[:, H:2 * H] + gh[:, H:2 * H])
        n = jnp.tanh(gi[:, 2 * H:] + r * gh[:, 2 * H:])
        h = (1.0 - z) * n + z * h
        new_h.append(h)
        x = h
    y = jnp.dot(x, params["w_dec"], precision=hp) + params["b_dec"]
    return y, jnp.stack(new_h, axis=0)


def rnn_model_forward_seq_ref(x_seq, hidden, params):
    ys = []
    for t in range(x_seq.shape[0]):
        y, hidden = rnn_model_forward_ref(x_seq[t], hidden, params)
        ys.append(y)
    return jnp.stack(ys, axis=0), hidden


def init_params(key, input_size, hidden_size, output_size, n_layers):
    ks = jax.random.split(key, 7)
    s = 1.0 / jnp.sqrt(hidden_size)
    return {
        "embedding": jax.random.uniform(ks[0], (input_size, hidden_size), jnp.float32, -s, s),
        # GRU weights stored pre-transposed: (in_features, 3*hidden), gate order r|z|n (PyTorch).
        "w_ih": jax.random.uniform(ks[1], (n_layers, hidden_size, 3 * hidden_size), jnp.float32, -s, s),
        "w_hh": jax.random.uniform(ks[2], (n_layers, hidden_size, 3 * hidden_size), jnp.float32, -s, s),
        "b_ih": jax.random.uniform(ks[3], (n_layers, 3 * hidden_size), jnp.float32, -s, s),
        "b_hh": jax.random.uniform(ks[4], (n_layers, 3 * hidden_size), jnp.float32, -s, s),
        "w_dec": jax.random.uniform(ks[5], (hidden_size, output_size), jnp.float32, -s, s),
        "b_dec": jax.random.uniform(ks[6], (output_size,), jnp.float32, -s, s),
    }


if __name__ == "__main__":
    INPUT_SIZE = 16     # vocab
    HIDDEN = 32
    OUTPUT = 16
    N_LAYERS = 2
    BATCH = 2
    SEQ = 8             # fused autoregressive steps in one launch

    key = jax.random.PRNGKey(0)
    k_par, k_x = jax.random.split(key)
    params = init_params(k_par, INPUT_SIZE, HIDDEN, OUTPUT, N_LAYERS)
    kparams = prepare_kernel_params(params)          # bf16 / tight layout, one-time

    x_seq = jax.random.randint(k_x, (SEQ, BATCH), 0, INPUT_SIZE, dtype=jnp.int32)
    hidden0 = jnp.zeros((N_LAYERS, BATCH, HIDDEN), jnp.float32)   # init_hidden

    # --- single forward() step (T=1), exactly RNNModel.forward(x, hidden) ---
    y1, h1 = rnn_model_forward(x_seq[0], hidden0, kparams)
    y1 = jax.block_until_ready(y1)
    h1 = jax.block_until_ready(h1)
    assert y1.shape == (BATCH, OUTPUT) and h1.shape == (N_LAYERS, BATCH, HIDDEN)

    # --- SEQ fused forward() steps in one kernel launch (weights stay VMEM-resident) ---
    y_seq, h_T = rnn_model_forward_seq(x_seq, hidden0, kparams)
    y_seq = jax.block_until_ready(y_seq)
    h_T = jax.block_until_ready(h_T)
    assert y_seq.shape == (SEQ, BATCH, OUTPUT) and h_T.shape == (N_LAYERS, BATCH, HIDDEN)

    # References: with the same bf16-rounded weights (tight check) and full-f32 weights (sanity).
    params_bf = dict(params)
    for name in ("embedding", "w_ih", "w_hh", "w_dec"):
        params_bf[name] = params[name].astype(jnp.bfloat16).astype(jnp.float32)

    y1_ref, h1_ref = rnn_model_forward_ref(x_seq[0], hidden0, params_bf)
    yS_ref, hT_ref = rnn_model_forward_seq_ref(x_seq, hidden0, params_bf)
    y1_f32, h1_f32 = rnn_model_forward_ref(x_seq[0], hidden0, params)

    assert jnp.allclose(y1, y1_ref, atol=1e-3, rtol=1e-3)
    assert jnp.allclose(h1, h1_ref, atol=1e-3, rtol=1e-3)
    assert jnp.allclose(y_seq, yS_ref, atol=2e-3, rtol=2e-3)
    assert jnp.allclose(h_T, hT_ref, atol=2e-3, rtol=2e-3)
    # bf16 weight rounding stays small vs. the full-f32 PyTorch-equivalent reference:
    assert jnp.allclose(y1, y1_f32, atol=5e-2, rtol=5e-2)
    assert jnp.allclose(h1, h1_f32, atol=5e-2, rtol=5e-2)
    # step 0 of the fused sequence reproduces the single-step forward
    assert jnp.allclose(y_seq[0], y1, atol=1e-5, rtol=1e-5)

    print("KERNEL_OK")
</pallas_src>

<mosaic_0001>
module attributes {stable_mosaic.version = 11 : i64} {
  func.func @rnn_fused_kernel(%arg0: i32, %arg1: memref<1x2xi32, #tpu.memory_space<smem>>, %arg2: memref<16x32xbf16, #tpu.memory_space<vmem>>, %arg3: memref<2x2x32xf32, #tpu.memory_space<vmem>>, %arg4: memref<2x32x96xbf16, #tpu.memory_space<vmem>>, %arg5: memref<2x32x96xbf16, #tpu.memory_space<vmem>>, %arg6: memref<2x1x96xf32, #tpu.memory_space<vmem>>, %arg7: memref<2x1x96xf32, #tpu.memory_space<vmem>>, %arg8: memref<32x16xbf16, #tpu.memory_space<vmem>>, %arg9: memref<1x16xf32, #tpu.memory_space<vmem>>, %arg10: memref<2x2x32xf32, #tpu.memory_space<vmem>>, %arg11: memref<1x2x16xf32, #tpu.memory_space<vmem>>) attributes {dimension_semantics = [#tpu.dimension_semantics<arbitrary>], iteration_bounds = array<i64: 1>, scalar_prefetch = 1 : i64, scratch_operands = 0 : i64, tpu.core_type = #tpu.core_type<tc>, window_params = [{pipeline_mode = #tpu.pipeline_mode<synchronous>, transform_indices = @transform_0, window_bounds = array<i64: 16, 32>}, {pipeline_mode = #tpu.pipeline_mode<synchronous>, transform_indices = @transform_1, window_bounds = array<i64: 2, 2, 32>}, {pipeline_mode = #tpu.pipeline_mode<synchronous>, transform_indices = @transform_2, window_bounds = array<i64: 2, 32, 96>}, {pipeline_mode = #tpu.pipeline_mode<synchronous>, transform_indices = @transform_3, window_bounds = array<i64: 2, 32, 96>}, {pipeline_mode = #tpu.pipeline_mode<synchronous>, transform_indices = @transform_4, window_bounds = array<i64: 2, 1, 96>}, {pipeline_mode = #tpu.pipeline_mode<synchronous>, transform_indices = @transform_5, window_bounds = array<i64: 2, 1, 96>}, {pipeline_mode = #tpu.pipeline_mode<synchronous>, transform_indices = @transform_6, window_bounds = array<i64: 32, 16>}, {pipeline_mode = #tpu.pipeline_mode<synchronous>, transform_indices = @transform_7, window_bounds = array<i64: 1, 16>}, {pipeline_mode = #tpu.pipeline_mode<synchronous>, transform_indices = @transform_8, window_bounds = array<i64: 2, 2, 32>}, {transform_indices = @transform_9, window_bounds = array<i64: 1, 2, 16>}]} {
    %c0_i32 = arith.constant 0 : i32
    %0 = arith.cmpi eq, %arg0, %c0_i32 : i32
    %1 = arith.extui %0 : i1 to i32
    %c0_i32_0 = arith.constant 0 : i32
    %2 = arith.cmpi ne, %1, %c0_i32_0 : i32
    scf.if %2 {
      %c0_57 = arith.constant 0 : index
      %c0_58 = arith.constant 0 : index
      %c0_59 = arith.constant 0 : index
      %123 = vector.load %arg3[%c0_57, %c0_58, %c0_59] : memref<2x2x32xf32, #tpu.memory_space<vmem>>, vector<2x2x32xf32>
      %c0_60 = arith.constant 0 : index
      %c0_61 = arith.constant 0 : index
      %c0_62 = arith.constant 0 : index
      %124 = vector.load %arg10[%c0_60, %c0_61, %c0_62] : memref<2x2x32xf32, #tpu.memory_space<vmem>>, vector<2x2x32xf32>
      tpu.vector_store %arg10[%c0_60, %c0_61, %c0_62], %123 {strides = array<i32>} : memref<2x2x32xf32, #tpu.memory_space<vmem>>, vector<2x2x32xf32>,
    } else {
    }
    %3 = tpu.iota {dimensions = array<i32: 1>} : vector<1x16xi32>
    %4 = arith.index_cast %arg0 : i32 to index
    %c0 = arith.constant 0 : index
    %5 = memref.load %arg1[%4, %c0] : memref<1x2xi32, #tpu.memory_space<smem>>
    %6 = vector.broadcast %5 : i32 to vector<1x16xi32>
    %7 = arith.cmpi eq, %3, %6 : vector<1x16xi32>
    %8 = arith.extui %7 : vector<1x16xi1> to vector<1x16xi32>
    %9 = arith.sitofp %8 : vector<1x16xi32> to vector<1x16xf32>
    %10 = arith.index_cast %arg0 : i32 to index
    %c1 = arith.constant 1 : index
    %11 = memref.load %arg1[%10, %c1] : memref<1x2xi32, #tpu.memory_space<smem>>
    %12 = vector.broadcast %11 : i32 to vector<1x16xi32>
    %13 = arith.cmpi eq, %3, %12 : vector<1x16xi32>
    %14 = arith.extui %13 : vector<1x16xi1> to vector<1x16xi32>
    %15 = arith.sitofp %14 : vector<1x16xi32> to vector<1x16xf32>
    %16 = tpu.concatenate %9, %15 in 0 : vector<1x16xf32>, vector<1x16xf32> -> vector<2x16xf32>
    %c0_1 = arith.constant 0 : index
    %c0_2 = arith.constant 0 : index
    %17 = vector.load %arg2[%c0_1, %c0_2] : memref<16x32xbf16, #tpu.memory_space<vmem>>, vector<16x32xbf16>
    %18 = arith.extf %17 : vector<16x32xbf16> to vector<16x32xf32>
    %cst = arith.constant dense<0.000000e+00> : vector<2x32xf32>
    %19 = tpu.matmul %16, %18, %cst {dimension_numbers = #tpu.dot_dimension_numbers<[1], [0], [0], [1], [0, 0, 1, 1], [], []>} : vector<2x16xf32>, vector<16x32xf32>, vector<2x32xf32> -> vector<2x32xf32>
    %c0_3 = arith.constant 0 : index
    %c0_4 = arith.constant 0 : index
    %c0_5 = arith.constant 0 : index
    %20 = vector.load %arg10[%c0_3, %c0_4, %c0_5] : memref<2x2x32xf32, #tpu.memory_space<vmem>>, vector<1x2x32xf32>
    %21 = vector.shape_cast %20 : vector<1x2x32xf32> to vector<2x32xf32>
    %c0_6 = arith.constant 0 : index
    %c0_7 = arith.constant 0 : index
    %c0_8 = arith.constant 0 : index
    %22 = vector.load %arg4[%c0_6, %c0_7, %c0_8] : memref<2x32x96xbf16, #tpu.memory_space<vmem>>, vector<1x32x96xbf16>
    %23 = vector.shape_cast %22 : vector<1x32x96xbf16> to vector<32x96xbf16>
    %24 = arith.extf %23 : vector<32x96xbf16> to vector<32x96xf32>
    %cst_9 = arith.constant dense<0.000000e+00> : vector<2x96xf32>
    %25 = tpu.matmul %19, %24, %cst_9 {dimension_numbers = #tpu.dot_dimension_numbers<[1], [0], [0], [1], [0, 0, 1, 1], [], []>} : vector<2x32xf32>, vector<32x96xf32>, vector<2x96xf32> -> vector<2x96xf32>
    %c0_10 = arith.constant 0 : index
    %c0_11 = arith.constant 0 : index
    %c0_12 = arith.constant 0 : index
    %26 = vector.load %arg6[%c0_10, %c0_11, %c0_12] : memref<2x1x96xf32, #tpu.memory_space<vmem>>, vector<1x1x96xf32>
    %27 = vector.shape_cast %26 : vector<1x1x96xf32> to vector<1x96xf32>
    %28 = vector.broadcast %27 : vector<1x96xf32> to vector<2x96xf32>
    %29 = arith.addf %25, %28 : vector<2x96xf32>
    %c0_13 = arith.constant 0 : index
    %c0_14 = arith.constant 0 : index
    %c0_15 = arith.constant 0 : index
    %30 = vector.load %arg5[%c0_13, %c0_14, %c0_15] : memref<2x32x96xbf16, #tpu.memory_space<vmem>>, vector<1x32x96xbf16>
    %31 = vector.shape_cast %30 : vector<1x32x96xbf16> to vector<32x96xbf16>
    %32 = arith.extf %31 : vector<32x96xbf16> to vector<32x96xf32>
    %cst_16 = arith.constant dense<0.000000e+00> : vector<2x96xf32>
    %33 = tpu.matmul %21, %32, %cst_16 {dimension_numbers = #tpu.dot_dimension_numbers<[1], [0], [0], [1], [0, 0, 1, 1], [], []>} : vector<2x32xf32>, vector<32x96xf32>, vector<2x96xf32> -> vector<2x96xf32>
    %c0_17 = arith.constant 0 : index
    %c0_18 = arith.constant 0 : index
    %c0_19 = arith.constant 0 : index
    %34 = vector.load %arg7[%c0_17, %c0_18, %c0_19] : memref<2x1x96xf32, #tpu.memory_space<vmem>>, vector<1x1x96xf32>
    %35 = vector.shape_cast %34 : vector<1x1x96xf32> to vector<1x96xf32>
    %36 = vector.broadcast %35 : vector<1x96xf32> to vector<2x96xf32>
    %37 = arith.addf %33, %36 : vector<2x96xf32>
    %38 = vector.extract_strided_slice %29 {offsets = [0, 0], sizes = [2, 32], strides = [1, 1]} : vector<2x96xf32> to vector<2x32xf32>
    %39 = vector.extract_strided_slice %37 {offsets = [0, 0], sizes = [2, 32], strides = [1, 1]} : vector<2x96xf32> to vector<2x32xf32>
    %40 = arith.addf %38, %39 : vector<2x32xf32>
    %41 = arith.negf %40 : vector<2x32xf32>
    %42 = math.exp %41 : vector<2x32xf32>
    %cst_20 = arith.constant 1.000000e+00 : f32
    %43 = vector.broadcast %cst_20 : f32 to vector<2x32xf32>
    %44 = arith.addf %43, %42 : vector<2x32xf32>
    %45 = arith.divf %43, %44 : vector<2x32xf32>
    %46 = vector.extract_strided_slice %29 {offsets = [0, 32], sizes = [2, 32], strides = [1, 1]} : vector<2x96xf32> to vector<2x32xf32>
    %47 = vector.extract_strided_slice %37 {offsets = [0, 32], sizes = [2, 32], strides = [1, 1]} : vector<2x96xf32> to vector<2x32xf32>
    %48 = arith.addf %46, %47 : vector<2x32xf32>
    %49 = arith.negf %48 : vector<2x32xf32>
    %50 = math.exp %49 : vector<2x32xf32>
    %cst_21 = arith.constant 1.000000e+00 : f32
    %51 = vector.broadcast %cst_21 : f32 to vector<2x32xf32>
    %52 = arith.addf %51, %50 : vector<2x32xf32>
    %53 = arith.divf %51, %52 : vector<2x32xf32>
    %54 = vector.extract_strided_slice %29 {offsets = [0, 64], sizes = [2, 32], strides = [1, 1]} : vector<2x96xf32> to vector<2x32xf32>
    %55 = vector.extract_strided_slice %37 {offsets = [0, 64], sizes = [2, 32], strides = [1, 1]} : vector<2x96xf32> to vector<2x32xf32>
    %56 = arith.mulf %45, %55 : vector<2x32xf32>
    %57 = arith.addf %54, %56 : vector<2x32xf32>
    %58 = math.tanh %57 : vector<2x32xf32>
    %cst_22 = arith.constant 1.000000e+00 : f32
    %59 = vector.broadcast %cst_22 : f32 to vector<2x32xf32>
    %60 = arith.subf %59, %53 : vector<2x32xf32>
    %61 = arith.mulf %60, %58 : vector<2x32xf32>
    %62 = arith.mulf %53, %21 : vector<2x32xf32>
    %63 = arith.addf %61, %62 : vector<2x32xf32>
    %c0_23 = arith.constant 0 : index
    %c0_24 = arith.constant 0 : index
    %c0_25 = arith.constant 0 : index
    %64 = vector.load %arg10[%c0_23, %c0_24, %c0_25] : memref<2x2x32xf32, #tpu.memory_space<vmem>>, vector<1x2x32xf32>
    %65 = vector.shape_cast %64 : vector<1x2x32xf32> to vector<2x32xf32>
    %66 = vector.shape_cast %63 : vector<2x32xf32> to vector<1x2x32xf32>
    tpu.vector_store %arg10[%c0_23, %c0_24, %c0_25], %66 {strides = array<i32>} : memref<2x2x32xf32, #tpu.memory_space<vmem>>, vector<1x2x32xf32>,
    %c1_26 = arith.constant 1 : index
    %c0_27 = arith.constant 0 : index
    %c0_28 = arith.constant 0 : index
    %67 = vector.load %arg10[%c1_26, %c0_27, %c0_28] : memref<2x2x32xf32, #tpu.memory_space<vmem>>, vector<1x2x32xf32>
    %68 = vector.shape_cast %67 : vector<1x2x32xf32> to vector<2x32xf32>
    %c1_29 = arith.constant 1 : index
    %c0_30 = arith.constant 0 : index
    %c0_31 = arith.constant 0 : index
    %69 = vector.load %arg4[%c1_29, %c0_30, %c0_31] : memref<2x32x96xbf16, #tpu.memory_space<vmem>>, vector<1x32x96xbf16>
    %70 = vector.shape_cast %69 : vector<1x32x96xbf16> to vector<32x96xbf16>
    %71 = arith.extf %70 : vector<32x96xbf16> to vector<32x96xf32>
    %cst_32 = arith.constant dense<0.000000e+00> : vector<2x96xf32>
    %72 = tpu.matmul %63, %71, %cst_32 {dimension_numbers = #tpu.dot_dimension_numbers<[1], [0], [0], [1], [0, 0, 1, 1], [], []>} : vector<2x32xf32>, vector<32x96xf32>, vector<2x96xf32> -> vector<2x96xf32>
    %c1_33 = arith.constant 1 : index
    %c0_34 = arith.constant 0 : index
    %c0_35 = arith.constant 0 : index
    %73 = vector.load %arg6[%c1_33, %c0_34, %c0_35] : memref<2x1x96xf32, #tpu.memory_space<vmem>>, vector<1x1x96xf32>
    %74 = vector.shape_cast %73 : vector<1x1x96xf32> to vector<1x96xf32>
    %75 = vector.broadcast %74 : vector<1x96xf32> to vector<2x96xf32>
    %76 = arith.addf %72, %75 : vector<2x96xf32>
    %c1_36 = arith.constant 1 : index
    %c0_37 = arith.constant 0 : index
    %c0_38 = arith.constant 0 : index
    %77 = vector.load %arg5[%c1_36, %c0_37, %c0_38] : memref<2x32x96xbf16, #tpu.memory_space<vmem>>, vector<1x32x96xbf16>
    %78 = vector.shape_cast %77 : vector<1x32x96xbf16> to vector<32x96xbf16>
    %79 = arith.extf %78 : vector<32x96xbf16> to vector<32x96xf32>
    %cst_39 = arith.constant dense<0.000000e+00> : vector<2x96xf32>
    %80 = tpu.matmul %68, %79, %cst_39 {dimension_numbers = #tpu.dot_dimension_numbers<[1], [0], [0], [1], [0, 0, 1, 1], [], []>} : vector<2x32xf32>, vector<32x96xf32>, vector<2x96xf32> -> vector<2x96xf32>
    %c1_40 = arith.constant 1 : index
    %c0_41 = arith.constant 0 : index
    %c0_42 = arith.constant 0 : index
    %81 = vector.load %arg7[%c1_40, %c0_41, %c0_42] : memref<2x1x96xf32, #tpu.memory_space<vmem>>, vector<1x1x96xf32>
    %82 = vector.shape_cast %81 : vector<1x1x96xf32> to vector<1x96xf32>
    %83 = vector.broadcast %82 : vector<1x96xf32> to vector<2x96xf32>
    %84 = arith.addf %80, %83 : vector<2x96xf32>
    %85 = vector.extract_strided_slice %76 {offsets = [0, 0], sizes = [2, 32], strides = [1, 1]} : vector<2x96xf32> to vector<2x32xf32>
    %86 = vector.extract_strided_slice %84 {offsets = [0, 0], sizes = [2, 32], strides = [1, 1]} : vector<2x96xf32> to vector<2x32xf32>
    %87 = arith.addf %85, %86 : vector<2x32xf32>
    %88 = arith.negf %87 : vector<2x32xf32>
    %89 = math.exp %88 : vector<2x32xf32>
    %cst_43 = arith.constant 1.000000e+00 : f32
    %90 = vector.broadcast %cst_43 : f32 to vector<2x32xf32>
    %91 = arith.addf %90, %89 : vector<2x32xf32>
    %92 = arith.divf %90, %91 : vector<2x32xf32>
    %93 = vector.extract_strided_slice %76 {offsets = [0, 32], sizes = [2, 32], strides = [1, 1]} : vector<2x96xf32> to vector<2x32xf32>
    %94 = vector.extract_strided_slice %84 {offsets = [0, 32], sizes = [2, 32], strides = [1, 1]} : vector<2x96xf32> to vector<2x32xf32>
    %95 = arith.addf %93, %94 : vector<2x32xf32>
    %96 = arith.negf %95 : vector<2x32xf32>
    %97 = math.exp %96 : vector<2x32xf32>
    %cst_44 = arith.constant 1.000000e+00 : f32
    %98 = vector.broadcast %cst_44 : f32 to vector<2x32xf32>
    %99 = arith.addf %98, %97 : vector<2x32xf32>
    %100 = arith.divf %98, %99 : vector<2x32xf32>
    %101 = vector.extract_strided_slice %76 {offsets = [0, 64], sizes = [2, 32], strides = [1, 1]} : vector<2x96xf32> to vector<2x32xf32>
    %102 = vector.extract_strided_slice %84 {offsets = [0, 64], sizes = [2, 32], strides = [1, 1]} : vector<2x96xf32> to vector<2x32xf32>
    %103 = arith.mulf %92, %102 : vector<2x32xf32>
    %104 = arith.addf %101, %103 : vector<2x32xf32>
    %105 = math.tanh %104 : vector<2x32xf32>
    %cst_45 = arith.constant 1.000000e+00 : f32
    %106 = vector.broadcast %cst_45 : f32 to vector<2x32xf32>
    %107 = arith.subf %106, %100 : vector<2x32xf32>
    %108 = arith.mulf %107, %105 : vector<2x32xf32>
    %109 = arith.mulf %100, %68 : vector<2x32xf32>
    %110 = arith.addf %108, %109 : vector<2x32xf32>
    %c1_46 = arith.constant 1 : index
    %c0_47 = arith.constant 0 : index
    %c0_48 = arith.constant 0 : index
    %111 = vector.load %arg10[%c1_46, %c0_47, %c0_48] : memref<2x2x32xf32, #tpu.memory_space<vmem>>, vector<1x2x32xf32>
    %112 = vector.shape_cast %111 : vector<1x2x32xf32> to vector<2x32xf32>
    %113 = vector.shape_cast %110 : vector<2x32xf32> to vector<1x2x32xf32>
    tpu.vector_store %arg10[%c1_46, %c0_47, %c0_48], %113 {strides = array<i32>} : memref<2x2x32xf32, #tpu.memory_space<vmem>>, vector<1x2x32xf32>,
    %c0_49 = arith.constant 0 : index
    %c0_50 = arith.constant 0 : index
    %114 = vector.load %arg8[%c0_49, %c0_50] : memref<32x16xbf16, #tpu.memory_space<vmem>>, vector<32x16xbf16>
    %115 = arith.extf %114 : vector<32x16xbf16> to vector<32x16xf32>
    %cst_51 = arith.constant dense<0.000000e+00> : vector<2x16xf32>
    %116 = tpu.matmul %110, %115, %cst_51 {dimension_numbers = #tpu.dot_dimension_numbers<[1], [0], [0], [1], [0, 0, 1, 1], [], []>} : vector<2x32xf32>, vector<32x16xf32>, vector<2x16xf32> -> vector<2x16xf32>
    %c0_52 = arith.constant 0 : index
    %c0_53 = arith.constant 0 : index
    %117 = vector.load %arg9[%c0_52, %c0_53] : memref<1x16xf32, #tpu.memory_space<vmem>>, vector<1x16xf32>
    %118 = vector.broadcast %117 : vector<1x16xf32> to vector<2x16xf32>
    %119 = arith.addf %116, %118 : vector<2x16xf32>
    %c0_54 = arith.constant 0 : index
    %c0_55 = arith.constant 0 : index
    %c0_56 = arith.constant 0 : index
    %120 = vector.load %arg11[%c0_54, %c0_55, %c0_56] : memref<1x2x16xf32, #tpu.memory_space<vmem>>, vector<1x2x16xf32>
    %121 = vector.shape_cast %120 : vector<1x2x16xf32> to vector<2x16xf32>
    %122 = vector.shape_cast %119 : vector<2x16xf32> to vector<1x2x16xf32>
    tpu.vector_store %arg11[%c0_54, %c0_55, %c0_56], %122 {strides = array<i32>} : memref<1x2x16xf32, #tpu.memory_space<vmem>>, vector<1x2x16xf32>,
    return
  }
  func.func @transform_0(%arg0: i32, %arg1: memref<1x2xi32, #tpu.memory_space<smem>>) -> (i32, i32) {
    %c0_i32 = arith.constant 0 : i32
    %c0_i32_0 = arith.constant 0 : i32
    %c0_i32_1 = arith.constant 0 : i32
    return %c0_i32, %c0_i32_0 : i32, i32
  }
  func.func @transform_1(%arg0: i32, %arg1: memref<1x2xi32, #tpu.memory_space<smem>>) -> (i32, i32, i32) {
    %c0_i32 = arith.constant 0 : i32
    %c0_i32_0 = arith.constant 0 : i32
    %c0_i32_1 = arith.constant 0 : i32
    %c0_i32_2 = arith.constant 0 : i32
    return %c0_i32, %c0_i32_0, %c0_i32_1 : i32, i32, i32
  }
  func.func @transform_2(%arg0: i32, %arg1: memref<1x2xi32, #tpu.memory_space<smem>>) -> (i32, i32, i32) {
    %c0_i32 = arith.constant 0 : i32
    %c0_i32_0 = arith.constant 0 : i32
    %c0_i32_1 = arith.constant 0 : i32
    %c0_i32_2 = arith.constant 0 : i32
    return %c0_i32, %c0_i32_0, %c0_i32_1 : i32, i32, i32
  }
  func.func @transform_3(%arg0: i32, %arg1: memref<1x2xi32, #tpu.memory_space<smem>>) -> (i32, i32, i32) {
    %c0_i32 = arith.constant 0 : i32
    %c0_i32_0 = arith.constant 0 : i32
    %c0_i32_1 = arith.constant 0 : i32
    %c0_i32_2 = arith.constant 0 : i32
    return %c0_i32, %c0_i32_0, %c0_i32_1 : i32, i32, i32
  }
  func.func @transform_4(%arg0: i32, %arg1: memref<1x2xi32, #tpu.memory_space<smem>>) -> (i32, i32, i32) {
    %c0_i32 = arith.constant 0 : i32
    %c0_i32_0 = arith.constant 0 : i32
    %c0_i32_1 = arith.constant 0 : i32
    %c0_i32_2 = arith.constant 0 : i32
    return %c0_i32, %c0_i32_0, %c0_i32_1 : i32, i32, i32
  }
  func.func @transform_5(%arg0: i32, %arg1: memref<1x2xi32, #tpu.memory_space<smem>>) -> (i32, i32, i32) {
    %c0_i32 = arith.constant 0 : i32
    %c0_i32_0 = arith.constant 0 : i32
    %c0_i32_1 = arith.constant 0 : i32
    %c0_i32_2 = arith.constant 0 : i32
    return %c0_i32, %c0_i32_0, %c0_i32_1 : i32, i32, i32
  }
  func.func @transform_6(%arg0: i32, %arg1: memref<1x2xi32, #tpu.memory_space<smem>>) -> (i32, i32) {
    %c0_i32 = arith.constant 0 : i32
    %c0_i32_0 = arith.constant 0 : i32
    %c0_i32_1 = arith.constant 0 : i32
    return %c0_i32, %c0_i32_0 : i32, i32
  }
  func.func @transform_7(%arg0: i32, %arg1: memref<1x2xi32, #tpu.memory_space<smem>>) -> (i32, i32) {
    %c0_i32 = arith.constant 0 : i32
    %c0_i32_0 = arith.constant 0 : i32
    %c0_i32_1 = arith.constant 0 : i32
    return %c0_i32, %c0_i32_0 : i32, i32
  }
  func.func @transform_8(%arg0: i32, %arg1: memref<1x2xi32, #tpu.memory_space<smem>>) -> (i32, i32, i32) {
    %c0_i32 = arith.constant 0 : i32
    %c0_i32_0 = arith.constant 0 : i32
    %c0_i32_1 = arith.constant 0 : i32
    %c0_i32_2 = arith.constant 0 : i32
    return %c0_i32, %c0_i32_0, %c0_i32_1 : i32, i32, i32
  }
  func.func @transform_9(%arg0: i32, %arg1: memref<1x2xi32, #tpu.memory_space<smem>>) -> (i32, i32, i32) {
    %c0_i32 = arith.constant 0 : i32
    %c0_i32_0 = arith.constant 0 : i32
    %c0_i32_1 = arith.constant 0 : i32
    return %arg0, %c0_i32, %c0_i32_0 : i32, i32, i32
  }
}

</mosaic_0001>

<bundles_post_ra>
// kernel: tpu_custom_call.1
= control target key start
LH: loop header
LB: loop body
LE: loop exit
PB: predicated region body
PF: predicated region fallthrough
CT: control target
= control target key end

     0   :  { %s649_s16 = smov [#allocation3]   ;;  %s786_s0 = inlined_call_operand.vmem [shape: s32[1,2], index: 0, kind: input, shape index: {}]   ;;  %s787_s1 = inlined_call_operand.vmem [shape: bf16[16,32], index: 1, kind: input, shape index: {}]   ;;  %s788_s2 = inlined_call_operand.vmem [shape: f32[2,2,32], index: 2, kind: input, shape index: {}]   ;;  %s789_s3 = inlined_call_operand.hbm [shape: bf16[2,32,96], index: 3, kind: input, shape index: {}]   ;;  %s790_s4 = inlined_call_operand.hbm [shape: bf16[2,32,96], index: 4, kind: input, shape index: {}]   ;;  %s791_s5 = inlined_call_operand.vmem [shape: f32[2,1,96], index: 5, kind: input, shape index: {}]   ;;  %s792_s6 = inlined_call_operand.vmem [shape: f32[2,1,96], index: 6, kind: input, shape index: {}]   ;;  %s793_s7 = inlined_call_operand.vmem [shape: bf16[32,16], index: 7, kind: input, shape index: {}]   ;;  %s794_s8 = inlined_call_operand.vmem [shape: f32[1,16], index: 8, kind: input, shape index: {}]   ;;  %s795_s9 = inlined_call_operand.hbm [shape: f32[2,2,32], index: 9, kind: output, shape index: {0}]   ;;  %s796_s10 = inlined_call_operand.hbm [shape: f32[1,2,16], index: 10, kind: output, shape index: {1}]  }
   0x1   :  { %s17_s15 = sshll.u32 %s786_s0, 4  ;;  %s18_s15 = int_to_ptr.vmem [resolvable:$true] %s17_s15 }
   0x2   :  { %20 = dma.vmem_to_smem %s18_s15, 16, %s649_s16, [#allocation2] }
   0x3   :  { %639 = dma.done.wait [#allocation2], 16 }
   0x4   :  { %640 = vsyncadd [#allocation2], 4294967280 }
   0x5   :  { %23 = sfence }
   0x6   :  { %24 = vsyncpa [#allocation5], 0 }
   0x7   :  { %25 = vsyncpa [#allocation8], 0 }
   0x8   :  { %26 = vsyncpa [#allocation6], 0 }
   0x9   :  { %27 = vsyncpa [#allocation11], 0  ;;  %s36_s19 = sshll.u32 %s789_s3, 4  ;;  %s650_s20 = smov [#allocation4]   ;;  %s37_s19 = int_to_ptr.hbm [resolvable:$true] %s36_s19 }
   0xa   :  { %s38_s21 = sshll.u32 %s650_s20, 4  ;;  %s49_s23 = sshll.u32 %s790_s4, 4  ;;  %s39_s21 = int_to_ptr.vmem [resolvable:$true] %s38_s21  ;;  %s50_s23 = int_to_ptr.hbm [resolvable:$true] %s49_s23 }
   0xb   :  { %s651_s24 = smov 64   ;;  %s652_s25 = smov 4  }
   0xc   :  { %44 = dma.hbm_to_vmem [thread:$0]  %s37_s19, 512, %s39_s21, [#allocation5], %s651_s24, %s651_s24, %s652_s25  }
   0xd   :  { %s653_s26 = smov [#allocation7]  }
   0xe   :  { %s51_s27 = sshll.u32 %s653_s26, 4  ;;  %s52_s27 = int_to_ptr.vmem [resolvable:$true] %s51_s27 }
   0xf   :  { %57 = dma.hbm_to_vmem [thread:$0]  %s50_s23, 512, %s52_s27, [#allocation8], %s651_s24, %s651_s24, %s652_s25  }
  0x10   :  { %641 = dma.done.wait [#allocation5], 512  }
  0x11   :  { %642 = vsyncadd [#allocation5], 4294966784 }
  0x12   :  { %643 = dma.done.wait [#allocation8], 512  }
  0x13   :  { %644 = vsyncadd [#allocation8], 4294966784  ;;  %v83_v0 = vlaneseq  ;;  %s86_s3 = sld [smem:[#allocation3]]  ;;  %vm80_vm0 = vcmask 254976   ;;  %v455_v2 = vld [vmem:[%s787_s1] sm:$0xff]   ;;  %vm97_vm1 = vcmask 1040384  }
  0x14   :  { %s442_s28 = sld [smem:[#allocation3 + $0x1]]  ;;  %v499_v4 = vld [vmem:[#allocation7 + $0x8] sm:$0xff]   ;;  %v457_v5 = vunpack.c.h.bf16 %v455_v2  ;;  %v456_v6 = vunpack.c.l.bf16 %v455_v2  ;;  %v467_v8 = vld [vmem:[#allocation7] sm:$0xff]   ;;  %v654_v11 = vmov 0.0   ;;  %vm103_vm4 = vcmask 130048   ;;  %s655_s15 = smov 96  }
  0x15   :  { %v84_v1 = vand.u32 127, %v83_v0  ;;  %v78_v9 = vld [vmem:[%s788_s2] sm:$0x3]  ;;  %v498_v10 = vld [vmem:[#allocation4 + $0x8] sm:$0xff]   ;;  %v473_v13 = vunpack.c.h.bf16 %v499_v4  ;;  %v472_v14 = vunpack.c.l.bf16 %v499_v4  ;;  %v469_v19 = vunpack.c.h.bf16 %v467_v8  ;;  %s656_s16 = smov 32   ;;  %v501_v51 = vld [vmem:[#allocation7 + $0x18] sm:$0xff]  }
  0x16   :  { %81 = vst.msk [vmem:[#allocation9] sm:$0x3] %vm80_vm0, %v78_v9  ;;  %v459_v15 = vld [vmem:[#allocation4] sm:$0xff]   ;;  %121 = vmatpush.msra.mxu0 %v457_v5  ;;  %v465_v17 = vunpack.c.h.bf16 %v498_v10  ;;  %v464_v20 = vunpack.c.l.bf16 %v498_v10  ;;  %v468_v22 = vunpack.c.l.bf16 %v467_v8  ;;  %vm140_vm5 = vcmask 261120   ;;  %v483_v52 = vld [vmem:[#allocation7 + $0x10] sm:$0xff]   ;;  %v500_v56 = vld [vmem:[#allocation4 + $0x18] sm:$0xff]  }
  0x17   :  { %191 = vmatpush.msra.mxu2 %v473_v13  ;;  %v461_v21 = vunpack.c.h.bf16 %v459_v15  ;;  %v460_v24 = vunpack.c.l.bf16 %v459_v15  ;;  %v514_v26 = vld [vmem:[%s792_s6] ss:$0 sm:$0xff]  ;;  %v79_v53 = vld [vmem:[%s788_s2 + $0x2] sm:$0x3]  ;;  %v489_v54 = vunpack.c.h.bf16 %v501_v51  ;;  %v488_v55 = vunpack.c.l.bf16 %v501_v51  ;;  %v475_v57 = vld [vmem:[#allocation4 + $0x10] sm:$0xff]   ;;  %s657_s25 = smov [#allocation9]  }
  0x18   :  { %122 = vmatpush.msra.mxu0 %v456_v6  ;;  %156 = vmatpush.msra.mxu1 %v465_v17  ;;  %v515_v29 = vld [vmem:[%s791_s5] ss:$0 sm:$0xff]  ;;  %82 = vst.msk [vmem:[#allocation9 + $0x2] sm:$0x3] %vm80_vm0, %v79_v53  ;;  %v481_v58 = vunpack.c.h.bf16 %v500_v56  ;;  %v480_v59 = vunpack.c.l.bf16 %v500_v56  ;;  %v485_v60 = vunpack.c.h.bf16 %v483_v52  ;;  %v477_v61 = vunpack.c.h.bf16 %v475_v57  ;;  %v516_v8 = vld [vmem:[%s792_s6 + $0x1] ss:$0 sm:$0xff] }
  0x19   :  { %v87_v3 = vstv %s86_s3  ;;  %192 = vmatpush.msra.mxu2 %v472_v14  ;;  %v484_v62 = vunpack.c.l.bf16 %v483_v52  ;;  %v476_v63 = vunpack.c.l.bf16 %v475_v57  ;;  %s409_s26 = sshll.u32 %s657_s25, 4  ;;  %s658_s27 = smov 2   ;;  %vm403_vm14 = vcmask 123904   ;;  %s410_s26 = int_to_ptr.vmem [resolvable:$true] %s409_s26 }
  0x1a   :  { %vm88_vm2 = vcmp.eq.s32.totalorder %v84_v1, %v87_v3  ;;  %v93_v7 = vstv %s442_s28  ;;  %157 = vmatpush.msra.mxu1 %v464_v20  ;;  %314 = vmatpush.msrb.mxu0 %v489_v54  ;;  %s659_s4 = smov [#allocation10]   ;;  %s425_s11 = sshll.u32 %s796_s10, 4  ;;  %s426_s11 = int_to_ptr.hbm [resolvable:$true] %s425_s11 }
  0x1b   :  { %v441_v12 = vsel %vm88_vm2, 1.0, %v654_v11  ;;  %vm94_vm3 = vcmp.eq.s32.totalorder %v84_v1, %v93_v7  ;;  %193 = vmatpush.msra.mxu2 %v469_v19  ;;  %277 = vmatpush.msra.mxu3 %v481_v58  ;;  %s423_s29 = sshll.u32 %s659_s4, 4  ;;  %s424_s29 = int_to_ptr.vmem [resolvable:$true] %s423_s29 }
  0x1c   :  { %v443_v16 = vsel %vm94_vm3, 1.0, %v654_v11  ;;  %158 = vmatpush.msra.mxu1 %v461_v21  ;;  %315 = vmatpush.msrb.mxu0 %v488_v55  ;;  %v517_v11 = vld [vmem:[%s791_s5 + $0x1] ss:$0 sm:$0xff] }
  0x1d   :  { %v98_v18 = vsel %vm97_vm1, %v441_v12, %v443_v16  ;;  %v127_v23 = vld [vmem:[#allocation9] sm:$0x3]  ;;  %194 = vmatpush.msra.mxu2 %v468_v22  ;;  %278 = vmatpush.msra.mxu3 %v480_v59 }
  0x1e   :  { %444 = vmatmul.msk.f32.vlgmr.msra.gmra.mxu0 %vm103_vm4, %v98_v18  ;;  %446 = vmatmul.msk.f32.vlgmr.msra.gmra.mxu2 %vm140_vm5, %v127_v23 }
  0x1f   :  { %159 = vmatpush.msra.mxu1 %v460_v24  ;;  %316 = vmatpush.msrb.mxu0 %v485_v60  ;;  %v248_v0 = vld [vmem:[#allocation9 + $0x2] sm:$0x3] }
  0x20   :  { %279 = vmatpush.msra.mxu3 %v477_v61 }
  0x21   :  { %317 = vmatpush.msrb.mxu0 %v484_v62 }
  0x22   :  { %280 = vmatpush.msra.mxu3 %v476_v63 }
  0x26   :  { %451 = vmatmul.msk.f32.vlgmr.msrb.gmra.mxu0 %vm140_vm5, %v248_v0 }
  0x9b   :  { %v124_v25 = vpop.f32.mrf.mxu0 }
  0x9c   :  { %445 = vmatmul.msk.f32.vlgmr.msra.gmra.mxu1 %vm140_vm5, %v124_v25 }
  0xa1   :  { %v196_v27 = vpop.f32.mrf.mxu2 }
  0xa2   :  { %v197_v28 = vadd.f32 %v514_v26, %v196_v27 }
  0xa3   :  { %v319_v9 = vpop.f32.mrf.mxu0 }
  0xa4   :  { %220 = vrot.lane.b32.xlu0 %v197_v28, %s651_s24  ;;  %v320_v10 = vadd.f32 %v516_v8, %v319_v9 }
 0x116   :  { %v221_v43 = vpop.permute.xlu0 %220 }
 0x119   :  { %v161_v30 = vpop.f32.mrf.mxu1 }
 0x11a   :  { %v162_v31 = vadd.f32 %v515_v29, %v161_v30 }
 0x11c   :  { %v199_v32 = vadd.f32 %v197_v28, %v162_v31 }
 0x11e   :  { %v447_v33 = vmul.f32 -1.442695, %v199_v32 }
 0x120   :  { %519 = vpow2.f32 %v447_v33  ;;  %v502_v33 = vld [vmem:[%s793_s7 + $0x8] sm:$0xff]  }
 0x126   :  { %v520_v34 = vpop.eup %519 }
 0x127   :  { %v203_v35 = vadd.f32 1.0, %v520_v34  ;;  %v491_v34 = vld [vmem:[%s793_s7] sm:$0xff]   ;;  %s411_s7 = sshll.u32 %s795_s9, 4  ;;  %s412_s7 = int_to_ptr.hbm [resolvable:$true] %s411_s7 }
 0x129   :  { %521 = vrcp.f32 %v203_v35  ;;  %v215_v39 = vand.u32 2147483648, %v203_v35  ;;  %v213_v41 = vand.u32 2147483647, %v203_v35  ;;  %vm209_vm7 = vweird.f32 %v203_v35 }
 0x12b   :  { %v216_v44 = vor.u32 1.1754944e-38, %v215_v39  ;;  %vm214_vm9 = vcmp.eq.f32.partialorder %v213_v41, 8.507059e+37 }
 0x12f   :  { %v522_v36 = vpop.eup %521 }
 0x130   :  { %v205_v37 = vmul.f32 %v522_v36, %v203_v35  ;;  %vm210_vm6 = vweird.f32 %v522_v36  ;;  %v497_v35 = vunpack.c.h.bf16 %v502_v33 }
 0x131   :  { %vm211_vm8 = vmor %vm209_vm7, %vm210_vm6 }
 0x132   :  { %v206_v38 = vsub.f32 1.0, %v205_v37  ;;  %395 = vmatpush.msrb.mxu1 %v497_v35  ;;  %v493_v37 = vunpack.c.h.bf16 %v491_v34 }
 0x134   :  { %v207_v40 = vmul.f32 %v522_v36, %v206_v38  ;;  %v492_v38 = vunpack.c.l.bf16 %v491_v34 }
 0x136   :  { %v208_v42 = vadd.f32 %v522_v36, %v207_v40 }
 0x138   :  { %v212_v45 = vsel %vm211_vm8, %v522_v36, %v208_v42  ;;  %v496_v36 = vunpack.c.l.bf16 %v502_v33 }
 0x139   :  { %v217_v46 = vsel %vm214_vm9, %v216_v44, %v212_v45 }
 0x13a   :  { %v223_v47 = vmul.f32 %v221_v43, %v217_v46  ;;  %v230_v2 = vsub.f32 1.0, %v217_v46  ;;  %396 = vmatpush.msrb.mxu1 %v496_v36 }
 0x13c   :  { %225 = vrot.lane.b32.xlu0 %v223_v47, %s651_s24  ;;  %397 = vmatpush.msrb.mxu1 %v493_v37 }
 0x13e   :  { %398 = vmatpush.msrb.mxu1 %v492_v38 }
 0x1ae   :  { %v226_v48 = vpop.permute.xlu0 %225 }
 0x1af   :  { %v228_v49 = vadd.f32 %v226_v48, %v162_v31 }
 0x1b1   :  { %523 = vtanh.f32 %v228_v49 }
 0x1b7   :  { %v524_v50 = vpop.eup %523 }
 0x1b8   :  { %232 = vrot.lane.b32.xlu1 %v524_v50, %s655_s15 }
 0x1c0   :  { %236 = vrot.lane.b32.xlu1 %v127_v23, %s656_s16 }
 0x22a   :  { %v233_v1 = vpop.permute.xlu1 %232 }
 0x22b   :  { %v235_v4 = vmul.f32 %v233_v1, %v230_v2 }
 0x232   :  { %v237_v3 = vpop.permute.xlu1 %236 }
 0x233   :  { %v239_v5 = vmul.f32 %v237_v3, %v217_v46  ;;  %v518_v46 = vld [vmem:[%s794_s8] ss:$0 sm:$0xff] }
 0x235   :  { %v240_v6 = vadd.f32 %v239_v5, %v235_v4 }
 0x237   :  { %242 = vrot.lane.b32.xlu2 %v240_v6, %s655_s15 }
 0x23f   :  { %343 = vrot.lane.b32.xlu2 %v320_v10, %s651_s24 }
 0x247   :  { %359 = vrot.lane.b32.xlu2 %v248_v0, %s656_s16 }
 0x291   :  { %v243_v7 = vpop.permute.xlu2 %242 }
 0x292   :  { %246 = vst.msk [vmem:[#allocation9] sm:$0x3] %vm80_vm0, %v243_v7  ;;  %449 = vmatmul.msk.f32.vlgmr.msra.gmra.mxu3 %vm140_vm5, %v243_v7 }
 0x299   :  { %v344_v28 = vpop.permute.xlu2 %343 }
 0x2a1   :  { %v360_v39 = vpop.permute.xlu2 %359 }
 0x315   :  { %v282_v12 = vpop.f32.mrf.mxu3 }
 0x316   :  { %v283_v13 = vadd.f32 %v517_v11, %v282_v12 }
 0x318   :  { %v322_v14 = vadd.f32 %v320_v10, %v283_v13 }
 0x31a   :  { %v452_v15 = vmul.f32 -1.442695, %v322_v14 }
 0x31c   :  { %525 = vpow2.f32 %v452_v15 }
 0x322   :  { %v526_v16 = vpop.eup %525 }
 0x323   :  { %v326_v17 = vadd.f32 1.0, %v526_v16 }
 0x325   :  { %527 = vrcp.f32 %v326_v17  ;;  %v338_v21 = vand.u32 2147483648, %v326_v17  ;;  %v336_v23 = vand.u32 2147483647, %v326_v17  ;;  %vm332_vm11 = vweird.f32 %v326_v17 }
 0x327   :  { %v339_v25 = vor.u32 1.1754944e-38, %v338_v21  ;;  %vm337_vm13 = vcmp.eq.f32.partialorder %v336_v23, 8.507059e+37 }
 0x32b   :  { %v528_v18 = vpop.eup %527 }
 0x32c   :  { %v328_v19 = vmul.f32 %v528_v18, %v326_v17  ;;  %vm333_vm10 = vweird.f32 %v528_v18 }
 0x32d   :  { %vm334_vm12 = vmor %vm332_vm11, %vm333_vm10 }
 0x32e   :  { %v329_v20 = vsub.f32 1.0, %v328_v19 }
 0x330   :  { %v330_v22 = vmul.f32 %v528_v18, %v329_v20 }
 0x332   :  { %v331_v24 = vadd.f32 %v528_v18, %v330_v22 }
 0x334   :  { %v335_v26 = vsel %vm334_vm12, %v528_v18, %v331_v24 }
 0x335   :  { %v340_v27 = vsel %vm337_vm13, %v339_v25, %v335_v26 }
 0x336   :  { %v346_v29 = vmul.f32 %v344_v28, %v340_v27  ;;  %v353_v40 = vsub.f32 1.0, %v340_v27  ;;  %v362_v42 = vmul.f32 %v360_v39, %v340_v27 }
 0x338   :  { %348 = vrot.lane.b32.xlu0 %v346_v29, %s651_s24 }
 0x3aa   :  { %v349_v30 = vpop.permute.xlu0 %348 }
 0x3ab   :  { %v351_v31 = vadd.f32 %v349_v30, %v283_v13 }
 0x3ad   :  { %529 = vtanh.f32 %v351_v31 }
 0x3b3   :  { %v530_v32 = vpop.eup %529 }
 0x3b4   :  { %355 = vrot.lane.b32.xlu1 %v530_v32, %s655_s15 }
 0x426   :  { %v356_v41 = vpop.permute.xlu1 %355 }
 0x427   :  { %v358_v43 = vmul.f32 %v356_v41, %v353_v40 }
 0x429   :  { %v363_v44 = vadd.f32 %v362_v42, %v358_v43 }
 0x42b   :  { %365 = vrot.lane.b32.xlu0 %v363_v44, %s655_s15 }
 0x49d   :  { %v366_v45 = vpop.permute.xlu0 %365 }
 0x49e   :  { %368 = vst.msk [vmem:[#allocation9 + $0x2] sm:$0x3] %vm80_vm0, %v366_v45  ;;  %453 = vmatmul.msk.f32.vlgmr.msrb.gmra.mxu1 %vm140_vm5, %v366_v45 }
 0x49f   :  { %417 = dma.vmem_to_hbm [thread:$0]  %s410_s26, 64, %s412_s7, [#allocation6], %s656_s16, %s656_s16, %s658_s27  }
 0x51b   :  { %v400_v47 = vpop.f32.mrf.mxu1 }
 0x51c   :  { %v401_v48 = vadd.f32 %v518_v46, %v400_v47 }
 0x51e   :  { %404 = vst.msk [vmem:[#allocation10] sm:$0x3] %vm403_vm14, %v401_v48 }
 0x51f   :  { %428 = dma.vmem_to_hbm [thread:$0]  %s424_s29, 32, %s426_s11, [#allocation11]  }
 0x520   :  { %645 = dma.done.wait [#allocation6], 64  }
 0x521   :  { %646 = vsyncadd [#allocation6], 4294967232 }
 0x522   :  { %647 = dma.done.wait [#allocation11], 32  }
 0x523   :  { %648 = vsyncadd [#allocation11], 4294967264 }
 0x524   :  { %437 = vsyncpa [#allocation5], 1 }
 0x525   :  { %438 = vsyncpa [#allocation8], 1 }
 0x526   :  { %439 = vsyncpa [#allocation6], 1 }
 0x527   :  { %440 = vsyncpa [#allocation11], 1 }

</bundles_post_ra>
